<compile_context>
chip_gen: v7x
topology: tpu7x:2x2x1
jax: 0.10.0
libtpu: 0.0.40
codegen_flags: <defaults>
</compile_context>

<pallas_src>
import jax
import jax.numpy as jnp
from jax import lax
from jax.experimental import pallas as pl
from jax.experimental.pallas import tpu as pltpu


def _make_kernel(n, c_in, c1, dim, h, w, lpad):
    """Builds the fused conv+ReLU+GAP+linear+MSE kernel (shapes are static)."""
    hw = h * w
    inv_hw = 1.0 / float(hw)
    inv_cnt = 1.0 / float(n * dim)
    offsets = [(dy, dx) for dy in (-1, 0, 1) for dx in (-1, 0, 1)]

    def kernel(x_ref, w1_ref, b1_ref, w2_ref, b2_ref, real_ref,
               loss_ref, acc_ref):
        i = pl.program_id(0)

        @pl.when(i == 0)
        def _init():
            acc_ref[0] = 0.0

        x = x_ref[0]                                       # [C, HWP] (lane-dense)

        # Column-position masks (hoisted): taps with dx != 0 must not read
        # across an image-row boundary of the flattened spatial axis.
        col = lax.broadcasted_iota(jnp.int32, (1, hw), 1)
        wpos = col % w
        mask_left = wpos >= 1            # valid lanes when dx == -1
        mask_right = wpos <= (w - 2)     # valid lanes when dx == +1

        # Fused im2col: 3x3 SAME conv as 9 shifted lane-dense matmuls,
        # accumulated in f32.  Vertical out-of-bounds taps land in the zero
        # padding of the flattened axis (lpad >= W+1 on each side).
        conv = jnp.zeros((c1, hw), jnp.float32)
        for t, (dy, dx) in enumerate(offsets):
            start = lpad + dy * w + dx                     # static Python int
            xs = x[:, start:start + hw]                    # [C_in, HW]
            if dx == -1:
                xs = jnp.where(mask_left, xs, 0.0)
            elif dx == 1:
                xs = jnp.where(mask_right, xs, 0.0)
            conv = conv + jnp.dot(w1_ref[t], xs,           # [C1,C_in]@[C_in,HW]
                                  preferred_element_type=jnp.float32)

        # Bias + ReLU (f32 elementwise, full 128-lane vregs).
        hrelu = jnp.maximum(conv + b1_ref[...], 0.0)       # [C1, HW]

        # Global average pool: one cross-lane reduce per sample.
        pooled = jnp.sum(hrelu, axis=1, keepdims=True) * inv_hw   # [C1, 1]

        # Regression head on VPU/XLU (avoids a 2-lane MXU matmul).
        pred = jnp.sum(w2_ref[...] * pooled, axis=0, keepdims=True) \
            + b2_ref[...]                                  # [1, DIM]

        # This sample's squared error (one-hot row select; no dynamic slice).
        rowmask = lax.broadcasted_iota(jnp.int32, (n, dim), 0) == i
        diff = real_ref[...] - pred                        # [N, DIM]
        acc_ref[0] += jnp.sum(jnp.where(rowmask, diff * diff, 0.0))

        @pl.when(i == pl.num_programs(0) - 1)
        def _finalize():
            loss_ref[0, 0] = acc_ref[0] * inv_cnt

    return kernel


def satellite_dist_regularizer_loss(real_vec, fake, w1, b1, w2, b2,
                                     mxu_dtype=jnp.float32):
    """real_vec: [N, dim] f32 ; fake: [N, C, H, W] f32 (NCHW, PyTorch layout)."""
    n, c, h, w = fake.shape
    c1, dim = w2.shape
    hw = h * w

    # Pad the flattened per-channel spatial axis so every tap shift is a
    # static in-bounds slice (>= W+1 zeros each side) and the padded length is
    # a multiple of 128 lanes.
    lpad = w + 1
    hwp = ((hw + 2 * lpad + 127) // 128) * 128
    rpad = hwp - hw - lpad

    x_flat = fake.reshape(n, c, hw)
    x_pad = jnp.pad(x_flat, ((0, 0), (0, 0), (lpad, rpad))).astype(mxu_dtype)

    # Conv taps: OIHW -> [KH*KW, C_out, C_in]; tap t = (dy+1)*3 + (dx+1).
    w1_taps = jnp.transpose(w1, (2, 3, 0, 1)).reshape(9, c1, c).astype(mxu_dtype)
    b1_col = b1.reshape(c1, 1).astype(jnp.float32)
    b2_row = b2.reshape(1, dim).astype(jnp.float32)
    w2_f = w2.astype(jnp.float32)
    real_f = real_vec.astype(jnp.float32)

    kernel = _make_kernel(n, c, c1, dim, h, w, lpad)

    itemsize = jnp.dtype(mxu_dtype).itemsize
    flops = 2 * n * hw * (9 * c) * c1 + n * (2 * c1 * hw + 2 * c1 * dim)
    bytes_accessed = (x_pad.size * itemsize + w1_taps.size * itemsize
                      + 4 * (b1_col.size + w2_f.size + b2_row.size
                             + real_f.size + 1))

    loss = pl.pallas_call(
        kernel,
        out_shape=jax.ShapeDtypeStruct((1, 1), jnp.float32),
        grid=(n,),
        in_specs=[
            pl.BlockSpec((1, c, hwp), lambda i: (i, 0, 0)),   # per-sample image
            pl.BlockSpec((9, c1, c), lambda i: (0, 0, 0)),    # conv taps
            pl.BlockSpec((c1, 1), lambda i: (0, 0)),          # conv bias
            pl.BlockSpec((c1, dim), lambda i: (0, 0)),        # head weight
            pl.BlockSpec((1, dim), lambda i: (0, 0)),         # head bias
            pl.BlockSpec((n, dim), lambda i: (0, 0)),         # real targets
        ],
        out_specs=pl.BlockSpec(memory_space=pltpu.MemorySpace.SMEM),
        scratch_shapes=[pltpu.SMEM((1,), jnp.float32)],
        compiler_params=pltpu.CompilerParams(
            dimension_semantics=("arbitrary",)),
        cost_estimate=pl.CostEstimate(flops=flops, transcendentals=0,
                                      bytes_accessed=bytes_accessed),
    )(x_pad, w1_taps, b1_col, w2_f, b2_row, real_f)
    return loss[0, 0]


def _reference_loss(real_vec, fake, w1, b1, w2, b2):
    """Pure-JAX reference for numerical validation."""
    out = lax.conv_general_dilated(
        fake, w1, window_strides=(1, 1), padding="SAME",
        dimension_numbers=("NCHW", "OIHW", "NCHW"))
    out = jnp.maximum(out + b1[None, :, None, None], 0.0)
    pooled = out.mean(axis=(2, 3))                         # [N, C1]
    pred = pooled @ w2 + b2[None, :]
    return jnp.mean((real_vec - pred) ** 2)


if __name__ == "__main__":
    # Small shapes consistent with the module's forward (img_size scaled down).
    N, C_IN, H, W = 2, 3, 16, 16
    C1, DIM = 16, 2

    key = jax.random.PRNGKey(0)
    k_fake, k_real, k_w1, k_b1, k_w2, k_b2 = jax.random.split(key, 6)

    fake = jax.random.normal(k_fake, (N, C_IN, H, W), jnp.float32)
    real_vec = jax.random.normal(k_real, (N, DIM), jnp.float32)

    # Deterministic synthetic parameters (conv: OIHW, like PyTorch).
    w1 = jax.random.normal(k_w1, (C1, C_IN, 3, 3), jnp.float32) * 0.1
    b1 = jax.random.normal(k_b1, (C1,), jnp.float32) * 0.1
    w2 = jax.random.normal(k_w2, (C1, DIM), jnp.float32) * 0.1
    b2 = jax.random.normal(k_b2, (DIM,), jnp.float32) * 0.1

    loss = jax.jit(satellite_dist_regularizer_loss)(
        real_vec, fake, w1, b1, w2, b2)
    jax.block_until_ready(loss)

    ref = _reference_loss(real_vec, fake, w1, b1, w2, b2)
    assert jnp.allclose(loss, ref, rtol=1e-3, atol=1e-5), (loss, ref)

    print("KERNEL_OK")
</pallas_src>

<mosaic_0001>
module attributes {stable_mosaic.version = 11 : i64} {
  func.func @kernel(%arg0: i32, %arg1: memref<1x3x384xf32, #tpu.memory_space<vmem>>, %arg2: memref<9x16x3xf32, #tpu.memory_space<vmem>>, %arg3: memref<16x1xf32, #tpu.memory_space<vmem>>, %arg4: memref<16x2xf32, #tpu.memory_space<vmem>>, %arg5: memref<1x2xf32, #tpu.memory_space<vmem>>, %arg6: memref<2x2xf32, #tpu.memory_space<vmem>>, %arg7: memref<1x1xf32, #tpu.memory_space<smem>>, %arg8: memref<1xf32, #tpu.memory_space<smem>>) attributes {dimension_semantics = [#tpu.dimension_semantics<arbitrary>], iteration_bounds = array<i64: 2>, scalar_prefetch = 0 : i64, scratch_operands = 1 : i64, tpu.core_type = #tpu.core_type<tc>, window_params = [{transform_indices = @transform_0, window_bounds = array<i64: 1, 3, 384>}, {pipeline_mode = #tpu.pipeline_mode<synchronous>, transform_indices = @transform_1, window_bounds = array<i64: 9, 16, 3>}, {pipeline_mode = #tpu.pipeline_mode<synchronous>, transform_indices = @transform_2, window_bounds = array<i64: 16, 1>}, {pipeline_mode = #tpu.pipeline_mode<synchronous>, transform_indices = @transform_3, window_bounds = array<i64: 16, 2>}, {pipeline_mode = #tpu.pipeline_mode<synchronous>, transform_indices = @transform_4, window_bounds = array<i64: 1, 2>}, {pipeline_mode = #tpu.pipeline_mode<synchronous>, transform_indices = @transform_5, window_bounds = array<i64: 2, 2>}, {transform_indices = @transform_6, window_bounds = array<i64: 1, 1>}]} {
    %c0_i32 = arith.constant 0 : i32
    %0 = arith.cmpi eq, %arg0, %c0_i32 : i32
    %1 = arith.extui %0 : i1 to i32
    %c0_i32_0 = arith.constant 0 : i32
    %2 = arith.cmpi ne, %1, %c0_i32_0 : i32
    scf.if %2 {
      %cst_60 = arith.constant 0.000000e+00 : f32
      %c0_61 = arith.constant 0 : index
      %131 = memref.load %arg8[%c0_61] : memref<1xf32, #tpu.memory_space<smem>>
      memref.store %cst_60, %arg8[%c0_61] : memref<1xf32, #tpu.memory_space<smem>>
    } else {
    }
    %c0 = arith.constant 0 : index
    %c0_1 = arith.constant 0 : index
    %c0_2 = arith.constant 0 : index
    %3 = vector.load %arg1[%c0, %c0_1, %c0_2] : memref<1x3x384xf32, #tpu.memory_space<vmem>>, vector<1x3x384xf32>
    %4 = vector.shape_cast %3 : vector<1x3x384xf32> to vector<3x384xf32>
    %5 = tpu.iota {dimensions = array<i32: 1>} : vector<1x256xi32>
    %c16_i32 = arith.constant 16 : i32
    %c0_i32_3 = arith.constant 0 : i32
    %6 = arith.cmpi eq, %c16_i32, %c0_i32_3 : i32
    %c1_i32 = arith.constant 1 : i32
    %7 = arith.select %6, %c1_i32, %c16_i32 : i32
    %8 = vector.broadcast %7 : i32 to vector<1x256xi32>
    %9 = arith.remsi %5, %8 : vector<1x256xi32>
    %c0_i32_4 = arith.constant 0 : i32
    %10 = vector.broadcast %c0_i32_4 : i32 to vector<1x256xi32>
    %11 = arith.cmpi ne, %9, %10 : vector<1x256xi32>
    %c0_i32_5 = arith.constant 0 : i32
    %12 = vector.broadcast %c0_i32_5 : i32 to vector<1x256xi32>
    %13 = arith.cmpi slt, %9, %12 : vector<1x256xi32>
    %c0_i32_6 = arith.constant 0 : i32
    %14 = arith.cmpi slt, %7, %c0_i32_6 : i32
    %15 = vector.broadcast %14 : i1 to vector<1x256xi1>
    %16 = vector.broadcast %15 : vector<1x256xi1> to vector<1x256xi1>
    %17 = arith.xori %13, %16 : vector<1x256xi1>
    %18 = arith.andi %17, %11 : vector<1x256xi1>
    %19 = vector.broadcast %7 : i32 to vector<1x256xi32>
    %20 = arith.addi %9, %19 : vector<1x256xi32>
    %21 = arith.select %18, %20, %9 : vector<1x256xi1>, vector<1x256xi32>
    %c1_i32_7 = arith.constant 1 : i32
    %22 = vector.broadcast %c1_i32_7 : i32 to vector<1x256xi32>
    %23 = arith.cmpi sge, %21, %22 : vector<1x256xi32>
    %c14_i32 = arith.constant 14 : i32
    %24 = vector.broadcast %c14_i32 : i32 to vector<1x256xi32>
    %25 = arith.cmpi sle, %21, %24 : vector<1x256xi32>
    %cst = arith.constant 0.000000e+00 : f32
    %26 = vector.broadcast %cst : f32 to vector<16x256xf32>
    %27 = vector.extract_strided_slice %4 {offsets = [0, 0], sizes = [3, 256], strides = [1, 1]} : vector<3x384xf32> to vector<3x256xf32>
    %cst_8 = arith.constant 0.000000e+00 : f32
    %28 = vector.shape_cast %23 : vector<1x256xi1> to vector<1x256xi1>
    %29 = vector.broadcast %28 : vector<1x256xi1> to vector<3x256xi1>
    %30 = vector.broadcast %cst_8 : f32 to vector<3x256xf32>
    %31 = arith.select %29, %27, %30 : vector<3x256xi1>, vector<3x256xf32>
    %c0_9 = arith.constant 0 : index
    %c0_10 = arith.constant 0 : index
    %c0_11 = arith.constant 0 : index
    %32 = vector.load %arg2[%c0_9, %c0_10, %c0_11] : memref<9x16x3xf32, #tpu.memory_space<vmem>>, vector<1x16x3xf32>
    %33 = vector.shape_cast %32 : vector<1x16x3xf32> to vector<16x3xf32>
    %cst_12 = arith.constant dense<0.000000e+00> : vector<16x256xf32>
    %34 = tpu.matmul %33, %31, %cst_12 {dimension_numbers = #tpu.dot_dimension_numbers<[1], [0], [0], [1], [0, 0, 1, 1], [], []>} : vector<16x3xf32>, vector<3x256xf32>, vector<16x256xf32> -> vector<16x256xf32>
    %35 = arith.addf %26, %34 : vector<16x256xf32>
    %36 = vector.extract_strided_slice %4 {offsets = [0, 1], sizes = [3, 256], strides = [1, 1]} : vector<3x384xf32> to vector<3x256xf32>
    %c1 = arith.constant 1 : index
    %c0_13 = arith.constant 0 : index
    %c0_14 = arith.constant 0 : index
    %37 = vector.load %arg2[%c1, %c0_13, %c0_14] : memref<9x16x3xf32, #tpu.memory_space<vmem>>, vector<1x16x3xf32>
    %38 = vector.shape_cast %37 : vector<1x16x3xf32> to vector<16x3xf32>
    %cst_15 = arith.constant dense<0.000000e+00> : vector<16x256xf32>
    %39 = tpu.matmul %38, %36, %cst_15 {dimension_numbers = #tpu.dot_dimension_numbers<[1], [0], [0], [1], [0, 0, 1, 1], [], []>} : vector<16x3xf32>, vector<3x256xf32>, vector<16x256xf32> -> vector<16x256xf32>
    %40 = arith.addf %35, %39 : vector<16x256xf32>
    %41 = vector.extract_strided_slice %4 {offsets = [0, 2], sizes = [3, 256], strides = [1, 1]} : vector<3x384xf32> to vector<3x256xf32>
    %cst_16 = arith.constant 0.000000e+00 : f32
    %42 = vector.shape_cast %25 : vector<1x256xi1> to vector<1x256xi1>
    %43 = vector.broadcast %42 : vector<1x256xi1> to vector<3x256xi1>
    %44 = vector.broadcast %cst_16 : f32 to vector<3x256xf32>
    %45 = arith.select %43, %41, %44 : vector<3x256xi1>, vector<3x256xf32>
    %c2 = arith.constant 2 : index
    %c0_17 = arith.constant 0 : index
    %c0_18 = arith.constant 0 : index
    %46 = vector.load %arg2[%c2, %c0_17, %c0_18] : memref<9x16x3xf32, #tpu.memory_space<vmem>>, vector<1x16x3xf32>
    %47 = vector.shape_cast %46 : vector<1x16x3xf32> to vector<16x3xf32>
    %cst_19 = arith.constant dense<0.000000e+00> : vector<16x256xf32>
    %48 = tpu.matmul %47, %45, %cst_19 {dimension_numbers = #tpu.dot_dimension_numbers<[1], [0], [0], [1], [0, 0, 1, 1], [], []>} : vector<16x3xf32>, vector<3x256xf32>, vector<16x256xf32> -> vector<16x256xf32>
    %49 = arith.addf %40, %48 : vector<16x256xf32>
    %50 = vector.extract_strided_slice %4 {offsets = [0, 16], sizes = [3, 256], strides = [1, 1]} : vector<3x384xf32> to vector<3x256xf32>
    %cst_20 = arith.constant 0.000000e+00 : f32
    %51 = vector.shape_cast %23 : vector<1x256xi1> to vector<1x256xi1>
    %52 = vector.broadcast %51 : vector<1x256xi1> to vector<3x256xi1>
    %53 = vector.broadcast %cst_20 : f32 to vector<3x256xf32>
    %54 = arith.select %52, %50, %53 : vector<3x256xi1>, vector<3x256xf32>
    %c3 = arith.constant 3 : index
    %c0_21 = arith.constant 0 : index
    %c0_22 = arith.constant 0 : index
    %55 = vector.load %arg2[%c3, %c0_21, %c0_22] : memref<9x16x3xf32, #tpu.memory_space<vmem>>, vector<1x16x3xf32>
    %56 = vector.shape_cast %55 : vector<1x16x3xf32> to vector<16x3xf32>
    %cst_23 = arith.constant dense<0.000000e+00> : vector<16x256xf32>
    %57 = tpu.matmul %56, %54, %cst_23 {dimension_numbers = #tpu.dot_dimension_numbers<[1], [0], [0], [1], [0, 0, 1, 1], [], []>} : vector<16x3xf32>, vector<3x256xf32>, vector<16x256xf32> -> vector<16x256xf32>
    %58 = arith.addf %49, %57 : vector<16x256xf32>
    %59 = vector.extract_strided_slice %4 {offsets = [0, 17], sizes = [3, 256], strides = [1, 1]} : vector<3x384xf32> to vector<3x256xf32>
    %c4 = arith.constant 4 : index
    %c0_24 = arith.constant 0 : index
    %c0_25 = arith.constant 0 : index
    %60 = vector.load %arg2[%c4, %c0_24, %c0_25] : memref<9x16x3xf32, #tpu.memory_space<vmem>>, vector<1x16x3xf32>
    %61 = vector.shape_cast %60 : vector<1x16x3xf32> to vector<16x3xf32>
    %cst_26 = arith.constant dense<0.000000e+00> : vector<16x256xf32>
    %62 = tpu.matmul %61, %59, %cst_26 {dimension_numbers = #tpu.dot_dimension_numbers<[1], [0], [0], [1], [0, 0, 1, 1], [], []>} : vector<16x3xf32>, vector<3x256xf32>, vector<16x256xf32> -> vector<16x256xf32>
    %63 = arith.addf %58, %62 : vector<16x256xf32>
    %64 = vector.extract_strided_slice %4 {offsets = [0, 18], sizes = [3, 256], strides = [1, 1]} : vector<3x384xf32> to vector<3x256xf32>
    %cst_27 = arith.constant 0.000000e+00 : f32
    %65 = vector.shape_cast %25 : vector<1x256xi1> to vector<1x256xi1>
    %66 = vector.broadcast %65 : vector<1x256xi1> to vector<3x256xi1>
    %67 = vector.broadcast %cst_27 : f32 to vector<3x256xf32>
    %68 = arith.select %66, %64, %67 : vector<3x256xi1>, vector<3x256xf32>
    %c5 = arith.constant 5 : index
    %c0_28 = arith.constant 0 : index
    %c0_29 = arith.constant 0 : index
    %69 = vector.load %arg2[%c5, %c0_28, %c0_29] : memref<9x16x3xf32, #tpu.memory_space<vmem>>, vector<1x16x3xf32>
    %70 = vector.shape_cast %69 : vector<1x16x3xf32> to vector<16x3xf32>
    %cst_30 = arith.constant dense<0.000000e+00> : vector<16x256xf32>
    %71 = tpu.matmul %70, %68, %cst_30 {dimension_numbers = #tpu.dot_dimension_numbers<[1], [0], [0], [1], [0, 0, 1, 1], [], []>} : vector<16x3xf32>, vector<3x256xf32>, vector<16x256xf32> -> vector<16x256xf32>
    %72 = arith.addf %63, %71 : vector<16x256xf32>
    %73 = vector.extract_strided_slice %4 {offsets = [0, 32], sizes = [3, 256], strides = [1, 1]} : vector<3x384xf32> to vector<3x256xf32>
    %cst_31 = arith.constant 0.000000e+00 : f32
    %74 = vector.shape_cast %23 : vector<1x256xi1> to vector<1x256xi1>
    %75 = vector.broadcast %74 : vector<1x256xi1> to vector<3x256xi1>
    %76 = vector.broadcast %cst_31 : f32 to vector<3x256xf32>
    %77 = arith.select %75, %73, %76 : vector<3x256xi1>, vector<3x256xf32>
    %c6 = arith.constant 6 : index
    %c0_32 = arith.constant 0 : index
    %c0_33 = arith.constant 0 : index
    %78 = vector.load %arg2[%c6, %c0_32, %c0_33] : memref<9x16x3xf32, #tpu.memory_space<vmem>>, vector<1x16x3xf32>
    %79 = vector.shape_cast %78 : vector<1x16x3xf32> to vector<16x3xf32>
    %cst_34 = arith.constant dense<0.000000e+00> : vector<16x256xf32>
    %80 = tpu.matmul %79, %77, %cst_34 {dimension_numbers = #tpu.dot_dimension_numbers<[1], [0], [0], [1], [0, 0, 1, 1], [], []>} : vector<16x3xf32>, vector<3x256xf32>, vector<16x256xf32> -> vector<16x256xf32>
    %81 = arith.addf %72, %80 : vector<16x256xf32>
    %82 = vector.extract_strided_slice %4 {offsets = [0, 33], sizes = [3, 256], strides = [1, 1]} : vector<3x384xf32> to vector<3x256xf32>
    %c7 = arith.constant 7 : index
    %c0_35 = arith.constant 0 : index
    %c0_36 = arith.constant 0 : index
    %83 = vector.load %arg2[%c7, %c0_35, %c0_36] : memref<9x16x3xf32, #tpu.memory_space<vmem>>, vector<1x16x3xf32>
    %84 = vector.shape_cast %83 : vector<1x16x3xf32> to vector<16x3xf32>
    %cst_37 = arith.constant dense<0.000000e+00> : vector<16x256xf32>
    %85 = tpu.matmul %84, %82, %cst_37 {dimension_numbers = #tpu.dot_dimension_numbers<[1], [0], [0], [1], [0, 0, 1, 1], [], []>} : vector<16x3xf32>, vector<3x256xf32>, vector<16x256xf32> -> vector<16x256xf32>
    %86 = arith.addf %81, %85 : vector<16x256xf32>
    %87 = vector.extract_strided_slice %4 {offsets = [0, 34], sizes = [3, 256], strides = [1, 1]} : vector<3x384xf32> to vector<3x256xf32>
    %cst_38 = arith.constant 0.000000e+00 : f32
    %88 = vector.shape_cast %25 : vector<1x256xi1> to vector<1x256xi1>
    %89 = vector.broadcast %88 : vector<1x256xi1> to vector<3x256xi1>
    %90 = vector.broadcast %cst_38 : f32 to vector<3x256xf32>
    %91 = arith.select %89, %87, %90 : vector<3x256xi1>, vector<3x256xf32>
    %c8 = arith.constant 8 : index
    %c0_39 = arith.constant 0 : index
    %c0_40 = arith.constant 0 : index
    %92 = vector.load %arg2[%c8, %c0_39, %c0_40] : memref<9x16x3xf32, #tpu.memory_space<vmem>>, vector<1x16x3xf32>
    %93 = vector.shape_cast %92 : vector<1x16x3xf32> to vector<16x3xf32>
    %cst_41 = arith.constant dense<0.000000e+00> : vector<16x256xf32>
    %94 = tpu.matmul %93, %91, %cst_41 {dimension_numbers = #tpu.dot_dimension_numbers<[1], [0], [0], [1], [0, 0, 1, 1], [], []>} : vector<16x3xf32>, vector<3x256xf32>, vector<16x256xf32> -> vector<16x256xf32>
    %95 = arith.addf %86, %94 : vector<16x256xf32>
    %c0_42 = arith.constant 0 : index
    %c0_43 = arith.constant 0 : index
    %96 = vector.load %arg3[%c0_42, %c0_43] : memref<16x1xf32, #tpu.memory_space<vmem>>, vector<16x1xf32>
    %97 = vector.broadcast %96 : vector<16x1xf32> to vector<16x256xf32>
    %98 = arith.addf %95, %97 : vector<16x256xf32>
    %cst_44 = arith.constant 0.000000e+00 : f32
    %99 = vector.broadcast %cst_44 : f32 to vector<16x256xf32>
    %100 = arith.maximumf %98, %99 : vector<16x256xf32>
    %cst_45 = arith.constant dense<0.000000e+00> : vector<16xf32>
    %101 = vector.multi_reduction <add>, %100, %cst_45 [1] : vector<16x256xf32> to vector<16xf32>
    %102 = vector.shape_cast %101 : vector<16xf32> to vector<16x1xf32>
    %cst_46 = arith.constant 3.906250e-03 : f32
    %103 = vector.broadcast %cst_46 : f32 to vector<16x1xf32>
    %104 = arith.mulf %102, %103 : vector<16x1xf32>
    %c0_47 = arith.constant 0 : index
    %c0_48 = arith.constant 0 : index
    %105 = vector.load %arg4[%c0_47, %c0_48] : memref<16x2xf32, #tpu.memory_space<vmem>>, vector<16x2xf32>
    %106 = vector.broadcast %104 : vector<16x1xf32> to vector<16x2xf32>
    %107 = arith.mulf %105, %106 : vector<16x2xf32>
    %cst_49 = arith.constant dense<0.000000e+00> : vector<2xf32>
    %108 = vector.multi_reduction <add>, %107, %cst_49 [0] : vector<16x2xf32> to vector<2xf32>
    %109 = vector.shape_cast %108 : vector<2xf32> to vector<1x2xf32>
    %c0_50 = arith.constant 0 : index
    %c0_51 = arith.constant 0 : index
    %110 = vector.load %arg5[%c0_50, %c0_51] : memref<1x2xf32, #tpu.memory_space<vmem>>, vector<1x2xf32>
    %111 = arith.addf %109, %110 : vector<1x2xf32>
    %112 = tpu.iota {dimensions = array<i32: 0>} : vector<2x2xi32>
    %113 = vector.broadcast %arg0 : i32 to vector<2x2xi32>
    %114 = arith.cmpi eq, %112, %113 : vector<2x2xi32>
    %c0_52 = arith.constant 0 : index
    %c0_53 = arith.constant 0 : index
    %115 = vector.load %arg6[%c0_52, %c0_53] : memref<2x2xf32, #tpu.memory_space<vmem>>, vector<2x2xf32>
    %116 = vector.broadcast %111 : vector<1x2xf32> to vector<2x2xf32>
    %117 = arith.subf %115, %116 : vector<2x2xf32>
    %c0_54 = arith.constant 0 : index
    %118 = memref.load %arg8[%c0_54] : memref<1xf32, #tpu.memory_space<smem>>
    %119 = arith.mulf %117, %117 : vector<2x2xf32>
    %cst_55 = arith.constant 0.000000e+00 : f32
    %120 = vector.broadcast %cst_55 : f32 to vector<2x2xf32>
    %121 = arith.select %114, %119, %120 : vector<2x2xi1>, vector<2x2xf32>
    %122 = vector.shape_cast %121 : vector<2x2xf32> to vector<1x2x2xf32>
    %cst_56 = arith.constant dense<0.000000e+00> : vector<1xf32>
    %123 = vector.multi_reduction <add>, %122, %cst_56 [1, 2] : vector<1x2x2xf32> to vector<1xf32>
    %124 = vector.shape_cast %123 : vector<1xf32> to vector<1x1x1xf32>
    %125 = vector.extract %124[0, 0, 0] : f32 from vector<1x1x1xf32>
    %126 = arith.addf %118, %125 : f32
    %c0_57 = arith.constant 0 : index
    %127 = memref.load %arg8[%c0_57] : memref<1xf32, #tpu.memory_space<smem>>
    memref.store %126, %arg8[%c0_57] : memref<1xf32, #tpu.memory_space<smem>>
    %c1_i32_58 = arith.constant 1 : i32
    %128 = arith.cmpi eq, %arg0, %c1_i32_58 : i32
    %129 = arith.extui %128 : i1 to i32
    %c0_i32_59 = arith.constant 0 : i32
    %130 = arith.cmpi ne, %129, %c0_i32_59 : i32
    scf.if %130 {
      %c0_60 = arith.constant 0 : index
      %131 = memref.load %arg8[%c0_60] : memref<1xf32, #tpu.memory_space<smem>>
      %cst_61 = arith.constant 2.500000e-01 : f32
      %132 = arith.mulf %131, %cst_61 : f32
      %c0_62 = arith.constant 0 : index
      %c0_63 = arith.constant 0 : index
      %133 = memref.load %arg7[%c0_62, %c0_63] : memref<1x1xf32, #tpu.memory_space<smem>>
      memref.store %132, %arg7[%c0_62, %c0_63] : memref<1x1xf32, #tpu.memory_space<smem>>
    } else {
    }
    return
  }
  func.func @transform_0(%arg0: i32) -> (i32, i32, i32) {
    %c0_i32 = arith.constant 0 : i32
    %c0_i32_0 = arith.constant 0 : i32
    %c0_i32_1 = arith.constant 0 : i32
    return %arg0, %c0_i32, %c0_i32_0 : i32, i32, i32
  }
  func.func @transform_1(%arg0: i32) -> (i32, i32, i32) {
    %c0_i32 = arith.constant 0 : i32
    %c0_i32_0 = arith.constant 0 : i32
    %c0_i32_1 = arith.constant 0 : i32
    %c0_i32_2 = arith.constant 0 : i32
    return %c0_i32, %c0_i32_0, %c0_i32_1 : i32, i32, i32
  }
  func.func @transform_2(%arg0: i32) -> (i32, i32) {
    %c0_i32 = arith.constant 0 : i32
    %c0_i32_0 = arith.constant 0 : i32
    %c0_i32_1 = arith.constant 0 : i32
    return %c0_i32, %c0_i32_0 : i32, i32
  }
  func.func @transform_3(%arg0: i32) -> (i32, i32) {
    %c0_i32 = arith.constant 0 : i32
    %c0_i32_0 = arith.constant 0 : i32
    %c0_i32_1 = arith.constant 0 : i32
    return %c0_i32, %c0_i32_0 : i32, i32
  }
  func.func @transform_4(%arg0: i32) -> (i32, i32) {
    %c0_i32 = arith.constant 0 : i32
    %c0_i32_0 = arith.constant 0 : i32
    %c0_i32_1 = arith.constant 0 : i32
    return %c0_i32, %c0_i32_0 : i32, i32
  }
  func.func @transform_5(%arg0: i32) -> (i32, i32) {
    %c0_i32 = arith.constant 0 : i32
    %c0_i32_0 = arith.constant 0 : i32
    %c0_i32_1 = arith.constant 0 : i32
    return %c0_i32, %c0_i32_0 : i32, i32
  }
  func.func @transform_6(%arg0: i32) -> (i32, i32) {
    %c0_i32 = arith.constant 0 : i32
    %c0_i32_0 = arith.constant 0 : i32
    %c0_i32_1 = arith.constant 0 : i32
    return %c0_i32, %c0_i32_0 : i32, i32
  }
}

</mosaic_0001>

<bundles_post_ra>
// kernel: satellite_dist_regularizer_loss.1
= control target key start
LH: loop header
LB: loop body
LE: loop exit
PB: predicated region body
PF: predicated region fallthrough
CT: control target
= control target key end

     0   :  { %11 = vsyncpa [#allocation4], 0  ;;  %s1564_s21 = smov 0   ;;  %s1817_s0 = inlined_call_operand.vmem [shape: f32[2,3,384], index: 0, kind: input, shape index: {}]   ;;  %s1818_s1 = inlined_call_operand.vmem [shape: f32[9,16,3], index: 1, kind: input, shape index: {}]   ;;  %s1819_s2 = inlined_call_operand.vmem [shape: f32[16,1], index: 2, kind: input, shape index: {}]   ;;  %s1820_s3 = inlined_call_operand.vmem [shape: f32[16,2], index: 3, kind: input, shape index: {}]   ;;  %s1821_s4 = inlined_call_operand.vmem [shape: f32[1,2], index: 4, kind: input, shape index: {}]   ;;  %s1822_s5 = inlined_call_operand.vmem [shape: f32[2,2], index: 5, kind: input, shape index: {}]   ;;  %s1823_s6 = inlined_call_operand.hbm [shape: f32[1,1], index: 6, kind: output, shape index: {}]  }
   0x1 LB: > { %s1570_s22 = sadd.s32 4294967295, %s1515_s21   ;;  %p1361_p0 = scmp.ge.s32.totalorder %s1515_s21, 1  ;;  %s1515_s21 = sphi %s1564_s21, %s17_s21  }
   0x2   : > { %p208_p1 = scmp.lt.s32.totalorder %s1515_s21, 3 }
   0x4   : > { %p209_p2 = pnand %p1361_p0, %p208_p1 }
   0x5   : > { %p233_p3 = scmp.lt.s32.totalorder (!%p209_p2), %s1570_s22, 1  ;;  %v1517_v0 = vmov (!%p209_p2), 0.0   ;;  %s1518_s28 = smov (!%p209_p2), 111   ;;  %v1526_v4 = vmov (!%p209_p2), 0   ;;  %v1234_v5 = vld [vmem:[%s1819_s2] sm:$0xff] (!%p209_p2)  ;;  %v1235_v6 = vld [vmem:[%s1819_s2 + $0x8] sm:$0xff] (!%p209_p2)  ;;  %v246_v7 = vlaneseq (!%p209_p2) }
   0x6   : > { %212 = sbr.rel (%p209_p2) target bundleno = 795 (0x31b), region = 44  ;;  %377 = vmatprep.mubr.f32.mxu1 (!%p209_p2), %v1517_v0  ;;  %787 = vmatprep.mubr.f32.mxu0 (!%p209_p2), %v1517_v0  ;;  %s1519_s29 = smov (!%p209_p2), 127   ;;  %vm298_vm1 = vcmask (!%p209_p2), 1039360   ;;  %vm710_vm2 = vcmask (!%p209_p2), 908288   ;;  %vm308_vm3 = vcmask (!%p209_p2), 1042432   ;;  %vm301_vm4 = vcmask (!%p209_p2), 23552  }
   0x7   : > { %s1520_s30 = smov (!%p209_p2), 110   ;;  %s1521_s7 = smov (!%p209_p2), 126   ;;  %1490 = vset.pattern.permute.xlu0 (!%p209_p2), %v1526_v4  ;;  %1491 = vset.pattern.permute.xlu1 (!%p209_p2), %v1526_v4  ;;  %v247_v8 = vand.u32 (!%p209_p2), 127, %v246_v7  ;;  %v1364_v25 = vld [vmem:[%s1818_s1 + $0x10] sm:$0xff] (!%p209_p2)  ;;  %vm810_vm6 = vcmask (!%p209_p2), 900096   ;;  %v1386_v26 = vld [vmem:[%s1818_s1 + $0x40] sm:$0xff] (!%p209_p2) }
   0x8   : > { %s1522_s8 = smov (!%p209_p2), 96   ;;  %s1523_s9 = smov (!%p209_p2), 112   ;;  %v1365_v32 = vld [vmem:[%s1818_s1 + $0x18] sm:$0xff] (!%p209_p2)  ;;  %v286_v38 = vld [vmem:[%s1818_s1] sm:$0xff] (!%p209_p2)  ;;  %vm489_vm9 = vcmask (!%p209_p2), 1031168   ;;  %v1392_v40 = vld [vmem:[%s1818_s1 + $0x50] sm:$0xff] (!%p209_p2) }
   0x9   : > { %s1524_s10 = smov (!%p209_p2), 95   ;;  %s1525_s11 = smov (!%p209_p2), 94   ;;  %v248_v9 = vadd.s32 (!%p209_p2), 128, %v247_v8  ;;  %v253_v15 = vand.u32 (!%p209_p2), 15, %v247_v8  ;;  %v287_v44 = vld [vmem:[%s1818_s1 + $0x8] sm:$0xff] (!%p209_p2)  ;;  %vm919_vm10 = vcmask (!%p209_p2), 785408  }
   0xa   : > { %v1393_v46 = vld [vmem:[%s1818_s1 + $0x58] sm:$0xff] (!%p209_p2)  ;;  %v1374_v51 = vld [vmem:[%s1818_s1 + $0x20] sm:$0xff] (!%p209_p2)  ;;  %v1375_v57 = vld [vmem:[%s1818_s1 + $0x28] sm:$0xff] (!%p209_p2)  ;;  %vm598_vm11 = vcmask (!%p209_p2), 916480   ;;  %vm1031_vm12 = vcmask (!%p209_p2), 777216   ;;  %vm1131_vm13 = vcmask (!%p209_p2), 769024  }
   0xb   : > { %v260_v12 = vand.u32 (!%p209_p2), 15, %v248_v9  ;;  %vm1617_vm5 = vcmp.ge.s32.totalorder (!%p209_p2), %v253_v15, 1  ;;  %vm1657_vm8 = vcmp.le.s32.totalorder (!%p209_p2), %v253_v15, 14  ;;  %v1398_v58 = vld [vmem:[%s1818_s1 + $0x60] sm:$0xff] (!%p209_p2)  ;;  %v1380_v4 = vld [vmem:[%s1818_s1 + $0x30] sm:$0xff] (!%p209_p2)  ;;  %v1381_v9 = vld [vmem:[%s1818_s1 + $0x38] sm:$0xff] (!%p209_p2) }
   0xc   : > { %v1405_v16 = vld [vmem:[%s1818_s1 + $0x78] sm:$0xff] (!%p209_p2)  ;;  %vm1266_vm14 = vcmask (!%p209_p2), 15360   ;;  %p1466_p4 = scmp.eq.s32.totalorder (!%p209_p2), %s1570_s22, 0  ;;  %s1527_s16 = smov (!%p209_p2), 0.0  }
   0xd   : > { %s234_s23 = scalar_select %p233_p3, %s1570_s22, 1  ;;  %vm1610_vm0 = vcmp.ge.s32.totalorder %v260_v12, 1  ;;  %vm1637_vm7 = vcmp.le.s32.totalorder %v260_v12, 14  ;;  %v1404_v12 = vld [vmem:[%s1818_s1 + $0x70] sm:$0xff] }
   0xe   : > { %1459 = sst [smem:[#allocation2]] (%p1466_p4), %s1527_s16  ;;  %p1467_p5 = scmp.eq.s32.totalorder %s1570_s22, 1 }
   0xf   : > { %s1455_s24 = smul.u32 12, %s234_s23  ;;  %s1288_s17 = sld [smem:[#allocation2]] }
  0x10   : > { %s1493_s25 = scalar_lea.hbm %s1823_s6, 16 }
  0x11   : > { %s237_s27 = scalar_lea.vmem %s1817_s0, %s1455_s24  ;;  %p1494_p6 = scmp.ne.s32.totalorder %s1823_s6, %s1493_s25 }
  0x12   : > { %v245_v1 = vld [vmem:[%s237_s27 + $0x8] sm:$0x7]  ;;  %v1581_v2 = vld [vmem:[%s237_s27] sm:$0x77]  ;;  %p1499_p9 = scmp.lt.u32.totalorder %s1493_s25, %s1823_s6 }
  0x13   : > { %708 = vrot.lane.b32.xlu1 %v245_v1, %s1518_s28  ;;  %296 = vrot.lane.b32.xlu0 %v245_v1, %s1519_s29  ;;  %v1587_v3 = vcombine.high %v1581_v2, %v1581_v2  ;;  %v284_v28 = vsel %vm1617_vm5, %v1581_v2, 0.0  ;;  %p1495_p7 = pnand %p1494_p6, %p1467_p5 }
  0x15   : > { %v285_v19 = vsel %vm1610_vm0, %v1587_v3, 0.0  ;;  %p1496_p8 = pneg %p1495_p7 }
  0x17   : > { %704 = vrot.lane.b32.xlu1 %v1581_v2, %s1518_s28  ;;  %292 = vrot.lane.b32.xlu0 %v1581_v2, %s1519_s29  ;;  %p1501_p10 = pnand %p1499_p9, %p1496_p8 }
  0x1b   : > { %706 = vrot.lane.b32.xlu1 %v1587_v3, %s1518_s28  ;;  %294 = vrot.lane.b32.xlu0 %v1587_v3, %s1519_s29 }
  0x1f   : > { %808 = vrot.lane.b32.xlu1 %v245_v1, %s1520_s30  ;;  %806 = vrot.lane.b32.xlu0 %v1587_v3, %s1520_s30 }
  0x23   : > { %485 = vrot.lane.b32.xlu1 %v1587_v3, %s1521_s7  ;;  %804 = vrot.lane.b32.xlu0 %v1581_v2, %s1520_s30 }
  0x27   : > { %915 = vrot.lane.b32.xlu1 %v1587_v3, %s1522_s8  ;;  %487 = vrot.lane.b32.xlu0 %v245_v1, %s1521_s7 }
  0x2b   : > { %483 = vrot.lane.b32.xlu1 %v1581_v2, %s1521_s7  ;;  %917 = vrot.lane.b32.xlu0 %v245_v1, %s1522_s8 }
  0x2f   : > { %594 = vrot.lane.b32.xlu1 %v1587_v3, %s1523_s9  ;;  %913 = vrot.lane.b32.xlu0 %v1581_v2, %s1522_s8 }
  0x33   : > { %592 = vrot.lane.b32.xlu1 %v1581_v2, %s1523_s9  ;;  %596 = vrot.lane.b32.xlu0 %v245_v1, %s1523_s9 }
  0x37   : > { %1029 = vrot.lane.b32.xlu1 %v245_v1, %s1524_s10  ;;  %1027 = vrot.lane.b32.xlu0 %v1587_v3, %s1524_s10 }
  0x3b   : > { %1127 = vrot.lane.b32.xlu1 %v1587_v3, %s1525_s11  ;;  %1025 = vrot.lane.b32.xlu0 %v1581_v2, %s1524_s10 }
  0x3f   : > { %1125 = vrot.lane.b32.xlu1 %v1581_v2, %s1525_s11  ;;  %1129 = vrot.lane.b32.xlu0 %v245_v1, %s1525_s11  ;;  %v1399_v1 = vld [vmem:[%s1818_s1 + $0x68] sm:$0xff] }
  0x43   : > { %1238 = vperm.xlu0 %1490, %v1234_v5   ;;  %1243 = vperm.xlu1 %1491, %v1235_v6  }
  0x85   : > { %v709_v10 = vpop.permute.xlu1 %708  ;;  %v297_v11 = vpop.permute.xlu0 %296 }
  0x89   : > { %v705_v13 = vpop.permute.xlu1 %704  ;;  %v293_v14 = vpop.permute.xlu0 %292 }
  0x8d   : > { %v707_v17 = vpop.permute.xlu1 %706  ;;  %v295_v18 = vpop.permute.xlu0 %294 }
  0x8e   : > { %v300_v21 = vsel %vm298_vm1, %v295_v18, %v297_v11  ;;  %v1621_v22 = vsel %vm710_vm2, %v707_v17, %v709_v10  ;;  %v299_v23 = vsel %vm298_vm1, %v293_v14, %v295_v18  ;;  %v1623_v24 = vsel %vm710_vm2, %v705_v13, %v707_v17 }
  0x8f   : > { %1366 = vmatprep.subr.msk.mxu1 %vm308_vm3, %v300_v21  ;;  %1388 = vmatprep.subr.msk.mxu0 %vm308_vm3, %v1621_v22  ;;  %v1387_v21 = vld [vmem:[%s1818_s1 + $0x48] sm:$0xff] }
  0x90   : > { %1367 = vmatpush1.msk.msra.mxu1 %vm308_vm3, %v299_v23  ;;  %1389 = vmatpush1.msk.msra.mxu0 %vm308_vm3, %v1623_v24  ;;  %v1411_v23 = vld [vmem:[%s1818_s1 + $0x88] sm:$0xff] }
  0x91   : > { %v809_v29 = vpop.permute.xlu1 %808  ;;  %v807_v30 = vpop.permute.xlu0 %806  ;;  %1368 = vmatmul.mubr.msk.f32.vlgmr.msra.gmra.mrb[0].mxu1 %vm301_vm4, %v1364_v25  ;;  %1370 = vmatprep.subr.msk.mxu1 %vm308_vm3, %v285_v19 }
  0x92   : > { %v812_v31 = vsel %vm810_vm6, %v807_v30, %v809_v29  ;;  %383 = vmatprep.mubr.f32.mxu1 %v1517_v0  ;;  %1390 = vmatmul.mubr.msk.f32.vlgmr.msra.gmra.mrb[0].mxu0 %vm301_vm4, %v1386_v26 }
  0x93   : > { %v816_v33 = vsel %vm1637_vm7, %v812_v31, 0.0  ;;  %1371 = vmatpush1.msk.msra.mxu1 %vm308_vm3, %v284_v28  ;;  %896 = vmatprep.mubr.f32.mxu0 %v1517_v0 }
  0x94   : > { %1394 = vmatprep.subr.msk.mxu0 %vm308_vm3, %v816_v33 }
  0x95   : > { %v486_v35 = vpop.permute.xlu1 %485  ;;  %v805_v36 = vpop.permute.xlu0 %804  ;;  %1369 = vmatmul.mubr.msk.f32.gmra.mrb[2].mxu1 %vm301_vm4, %v1365_v32 }
  0x96   : > { %v811_v37 = vsel %vm810_vm6, %v805_v36, %v807_v30  ;;  %466 = vmatprep.mubr.f32.mxu1 %v1517_v0 }
  0x97   : > { %v815_v39 = vsel %vm1657_vm8, %v811_v37, 0.0 }
  0x98   : > { %1395 = vmatpush1.msk.msra.mxu0 %vm308_vm3, %v815_v39 }
  0x99   : > { %v916_v41 = vpop.permute.xlu1 %915  ;;  %v488_v42 = vpop.permute.xlu0 %487  ;;  %1372 = vmatmul.mubr.msk.f32.vlgmr.msra.gmra.mrb[0].mxu1 %vm301_vm4, %v286_v38 }
  0x9a   : > { %v491_v43 = vsel %vm489_vm9, %v486_v35, %v488_v42  ;;  %472 = vmatprep.mubr.f32.mxu1 %v1517_v0  ;;  %1396 = vmatmul.mubr.msk.f32.vlgmr.msra.gmra.mrb[0].mxu0 %vm301_vm4, %v1392_v40 }
  0x9b   : > { %v495_v45 = vsel %vm1637_vm7, %v491_v43, 0.0  ;;  %902 = vmatprep.mubr.f32.mxu0 %v1517_v0 }
  0x9c   : > { %1376 = vmatprep.subr.msk.mxu1 %vm308_vm3, %v495_v45 }
  0x9d   : > { %v484_v47 = vpop.permute.xlu1 %483  ;;  %v918_v48 = vpop.permute.xlu0 %917  ;;  %1373 = vmatmul.mubr.msk.f32.gmra.mrb[2].mxu1 %vm301_vm4, %v287_v44 }
  0x9e   : > { %v490_v49 = vsel %vm489_vm9, %v484_v47, %v486_v35  ;;  %v921_v50 = vsel %vm919_vm10, %v916_v41, %v918_v48  ;;  %575 = vmatprep.mubr.f32.mxu1 %v1517_v0  ;;  %1397 = vmatmul.mubr.msk.f32.gmra.mrb[2].mxu0 %vm301_vm4, %v1393_v46 }
  0x9f   : > { %v494_v52 = vsel %vm1657_vm8, %v490_v49, 0.0  ;;  %v925_v53 = vsel %vm1610_vm0, %v921_v50, 0.0  ;;  %1005 = vmatprep.mubr.f32.mxu0 %v1517_v0  ;;  %v1262_v49 = vld [vmem:[%s1820_s3] sm:$0xff]  ;;  %v1263_v50 = vld [vmem:[%s1820_s3 + $0x8] sm:$0xff] }
  0xa0   : > { %1377 = vmatpush1.msk.msra.mxu1 %vm308_vm3, %v494_v52  ;;  %1400 = vmatprep.subr.msk.mxu0 %vm308_vm3, %v925_v53 }
  0xa1   : > { %v595_v54 = vpop.permute.xlu1 %594  ;;  %v914_v55 = vpop.permute.xlu0 %913  ;;  %1378 = vmatmul.mubr.msk.f32.vlgmr.msra.gmra.mrb[0].mxu1 %vm301_vm4, %v1374_v51 }
  0xa2   : > { %v920_v56 = vsel %vm919_vm10, %v914_v55, %v916_v41  ;;  %581 = vmatprep.mubr.f32.mxu1 %v1517_v0 }
  0xa3   : > { %v924_v59 = vsel %vm1617_vm5, %v920_v56, 0.0 }
  0xa4   : > { %1401 = vmatpush1.msk.msra.mxu0 %vm308_vm3, %v924_v59 }
  0xa5   : > { %v593_v60 = vpop.permute.xlu1 %592  ;;  %v597_v61 = vpop.permute.xlu0 %596  ;;  %1379 = vmatmul.mubr.msk.f32.gmra.mrb[2].mxu1 %vm301_vm4, %v1375_v57  ;;  %1402 = vmatmul.mubr.msk.f32.vlgmr.msra.gmra.mrb[0].mxu0 %vm301_vm4, %v1398_v58 }
  0xa6   : > { %v599_v62 = vsel %vm598_vm11, %v593_v60, %v595_v54  ;;  %v600_v63 = vsel %vm598_vm11, %v595_v54, %v597_v61  ;;  %684 = vmatprep.mubr.f32.mxu1 %v1517_v0  ;;  %1011 = vmatprep.mubr.f32.mxu0 %v1517_v0 }
  0xa7   : > { %v603_v2 = vsel %vm1617_vm5, %v599_v62, 0.0  ;;  %v604_v3 = vsel %vm1610_vm0, %v600_v63, 0.0  ;;  %v1279_v62 = vshrl.u32 %v246_v7, 7  ;;  %vm1291_vm0 = vcmask 9216  }
  0xa8   : > { %1382 = vmatprep.subr.msk.mxu1 %vm308_vm3, %v604_v3 }
  0xa9   : > { %v1030_v5 = vpop.permute.xlu1 %1029  ;;  %v1028_v6 = vpop.permute.xlu0 %1027  ;;  %1383 = vmatpush1.msk.msra.mxu1 %vm308_vm3, %v603_v2  ;;  %1403 = vmatmul.mubr.msk.f32.gmra.mrb[2].mxu0 %vm301_vm4, %v1399_v1  ;;  %v1276_v1 = vld [vmem:[%s1821_s4] sm:$0x1]  ;;  %v1285_v3 = vsub.s32 0, %v1279_v62 }
  0xaa   : > { %v1033_v8 = vsel %vm1031_vm12, %v1028_v6, %v1030_v5  ;;  %1384 = vmatmul.mubr.msk.f32.vlgmr.msra.gmra.mrb[0].mxu1 %vm301_vm4, %v1380_v4  ;;  %1421 = vmatprep.subr.msk.mxu1 %vm308_vm3, %v1621_v22  ;;  %v1410_v22 = vld [vmem:[%s1818_s1 + $0x80] sm:$0xff] }
  0xab   : > { %1422 = vmatpush1.msk.msra.mxu1 %vm308_vm3, %v1623_v24  ;;  %1406 = vmatprep.subr.msk.mxu0 %vm308_vm3, %v1033_v8  ;;  %v1282_v5 = vld [vmem:[%s1822_s5] sm:$0x3] }
  0xac   : > { %690 = vmatprep.mubr.f32.mxu1 %v1517_v0  ;;  %1108 = vmatprep.mubr.f32.mxu0 %v1517_v0 }
  0xad   : > { %v1128_v10 = vpop.permute.xlu1 %1127  ;;  %v1026_v11 = vpop.permute.xlu0 %1025 }
  0xae   : > { %v1032_v13 = vsel %vm1031_vm12, %v1026_v11, %v1028_v6  ;;  %1385 = vmatmul.mubr.msk.f32.gmra.mrb[2].mxu1 %vm301_vm4, %v1381_v9  ;;  %v1280_v6 = vstv %s1570_s22 }
  0xaf   : > { %1407 = vmatpush1.msk.msra.mxu0 %vm308_vm3, %v1032_v13  ;;  %793 = vmatprep.mubr.f32.mxu1 %v1517_v0  ;;  %vm1281_vm15 = vcmp.eq.s32.totalorder %v1279_v62, %v1280_v6 }
  0xb0   : > { %1408 = vmatmul.mubr.msk.f32.vlgmr.msra.gmra.mrb[0].mxu0 %vm301_vm4, %v1404_v12 }
  0xb1   : > { %v1126_v14 = vpop.permute.xlu1 %1125  ;;  %v1130_v15 = vpop.permute.xlu0 %1129  ;;  %1114 = vmatprep.mubr.f32.mxu0 %v1517_v0 }
  0xb2   : > { %v1132_v17 = vsel %vm1131_vm13, %v1126_v14, %v1128_v10  ;;  %v1133_v18 = vsel %vm1131_vm13, %v1128_v10, %v1130_v15 }
  0xb3   : > { %v1136_v19 = vsel %vm1657_vm8, %v1132_v17, 0.0  ;;  %v1137_v20 = vsel %vm1637_vm7, %v1133_v18, 0.0 }
  0xb4   : > { %1409 = vmatmul.mubr.msk.f32.gmra.mrb[2].mxu0 %vm301_vm4, %v1405_v16  ;;  %1412 = vmatprep.subr.msk.mxu0 %vm308_vm3, %v1137_v20 }
  0xb5   : > { %1413 = vmatpush1.msk.msra.mxu0 %vm308_vm3, %v1136_v19  ;;  %1217 = vmatprep.mubr.f32.mxu0 %v1517_v0 }
  0xb6   : > { %1391 = vmatmul.mubr.msk.f32.vlgmr.msra.gmra.mrb[2].mxu1 %vm301_vm4, %v1387_v21 }
  0xb8   : > { %1414 = vmatmul.mubr.msk.f32.vlgmr.msra.gmra.mrb[0].mxu0 %vm301_vm4, %v1410_v22 }
  0xb9   : > { %1223 = vmatprep.mubr.f32.mxu0 %v1517_v0 }
  0xbc   : > { %1415 = vmatmul.mubr.msk.f32.gmra.mrb[2].mxu0 %vm301_vm4, %v1411_v23 }
  0xc2   : > { %v1239_v29 = vpop.permute.xlu0 %1238  ;;  %v1244_v36 = vpop.permute.xlu1 %1243 }
 0x17d   : > { %v686_v24 = vpop.f32.mrb[0].mxu1 }
 0x17e   : > { %v688_v25 = vpop.f32.mrb[1].mxu1 }
 0x189   : > { %v795_v26 = vpop.f32.mrb[2].mxu1 }
 0x18a   : > { %v797_v27 = vpop.f32.mrb[3].mxu1 }
 0x18b   : > { %v1219_v28 = vpop.f32.mrb[0].mxu0 }
 0x18c   : > { %v1423_v30 = vadd.f32 %v1219_v28, %v686_v24  ;;  %v1221_v31 = vpop.f32.mrb[1].mxu0 }
 0x18d   : > { %v1424_v32 = vadd.f32 %v1221_v31, %v688_v25 }
 0x18e   : > { %v1246_v33 = vadd.f32 %v1423_v30, %v1239_v29 }
 0x18f   : > { %v1247_v34 = vadd.f32 %v1424_v32, %v1239_v29  ;;  %v1225_v35 = vpop.f32.mrb[2].mxu0 }
 0x190   : > { %v1250_v0 = vmax.f32 %v1246_v33, 0.0  ;;  %v1425_v37 = vadd.f32 %v1225_v35, %v795_v26  ;;  %v1227_v38 = vpop.f32.mrb[3].mxu0 }
 0x191   : > { %v1251_v39 = vmax.f32 %v1247_v34, 0.0  ;;  %v1426_v40 = vadd.f32 %v1227_v38, %v797_v27 }
 0x192   : > { %v1248_v41 = vadd.f32 %v1425_v37, %v1244_v36 }
 0x193   : > { %v1249_v42 = vadd.f32 %v1426_v40, %v1244_v36  ;;  %v1254_v43 = vadd.f32 %v1251_v39, %v1250_v0 }
 0x194   : > { %v1252_v44 = vmax.f32 %v1248_v41, 0.0 }
 0x195   : > { %v1253_v45 = vmax.f32 %v1249_v42, 0.0  ;;  %1255 = vadd.xlane.f32.xlu1 %v1254_v43 }
 0x197   : > { %v1257_v46 = vadd.f32 %v1253_v45, %v1252_v44 }
 0x199   : > { %1258 = vadd.xlane.f32.xlu0 %v1257_v46 }
 0x222   : > { %v1256_v47 = vpop.xlane.xlu1 %1255 }
 0x223   : > { %v1260_v48 = vmul.f32 0.00390625, %v1256_v47 }
 0x225   : > { %v1264_v52 = vmul.f32 %v1262_v49, %v1260_v48 }
 0x226   : > { %v1259_v51 = vpop.xlane.xlu0 %1258 }
 0x227   : > { %v1261_v53 = vmul.f32 0.00390625, %v1259_v51  ;;  %v1267_v55 = vsel %vm1266_vm14, %v1264_v52, 0.0 }
 0x229   : > { %v1265_v54 = vmul.f32 %v1263_v50, %v1261_v53 }
 0x22b   : > { %v1268_v56 = vsel %vm1266_vm14, %v1265_v54, 0.0 }
 0x22c   : > { %v1269_v57 = vadd.f32 %v1268_v56, %v1267_v55 }
 0x22e   : > { %v1270_v58 = vrot.slane %v1269_v57, 4 }
 0x230   : > { %v1271_v59 = vadd.f32 %v1270_v58, %v1269_v57 }
 0x232   : > { %v1272_v60 = vrot.slane %v1271_v59, 2 }
 0x234   : > { %v1273_v61 = vadd.f32 %v1272_v60, %v1271_v59 }
 0x236   : > { %v1274_v63 = vrot.slane %v1273_v61, 1 }
 0x238   : > { %v1275_v2 = vadd.f32 %v1274_v63, %v1273_v61 }
 0x23a   : > { %v1277_v4 = vadd.f32 %v1276_v1, %v1275_v2 }
 0x23c   : > { %v1286_v8 = vrot.slane %v1277_v4, %v1285_v3 }
 0x23e   : > { %v1287_v9 = vsub.f32 %v1282_v5, %v1286_v8 }
 0x240   : > { %v1289_v10 = vmul.f32 %v1287_v9, %v1287_v9 }
 0x242   : > { %v1290_v7 = vsel %vm1281_vm15, %v1289_v10, 0.0 }
 0x243   : > { %v1292_v11 = vsel %vm1291_vm0, %v1290_v7, 0.0 }
 0x244   : > { %1293 = vadd.xlane.f32.xlu0 %v1292_v11 }
 0x2d1   : > { %v1294_v12 = vpop.xlane.xlu0 %1293 }
 0x2d2   : > { %v1295_v13 = vrot.slane %v1294_v12, 4 }
 0x2d4   : > { %v1296_v14 = vadd.f32 %v1295_v13, %v1294_v12 }
 0x2d6   : > { %v1297_v15 = vrot.slane %v1296_v14, 2 }
 0x2d8   : > { %v1298_v16 = vadd.f32 %v1297_v15, %v1296_v14 }
 0x2da   : > { %v1299_v17 = vrot.slane %v1298_v16, 1 }
 0x2dc   : > { %v1300_v18 = vadd.f32 %v1299_v17, %v1298_v16 }
 0x2de   : > { %1456 = vpush %v1300_v18 }
 0x30f   : > { %s1457_s18 = spop %1456 }
 0x310   : > { %s1302_s19 = sadd.f32 %s1457_s18, %s1288_s17 }
 0x312   : > { %1304 = sst [smem:[#allocation2]] %s1302_s19  ;;  %s1310_s20 = smul.f32 0.25, %s1302_s19 }
 0x314   : > { %1461 = sst [smem:[#allocation3]] (%p1467_p5), %s1310_s20 }
 0x315   : > { %1504 = shalt.err (!%p1501_p10)
}
 0x316   : > { %s1528_s30 = smov [#allocation3]  }
 0x317   : > { %1463 = dma.smem_to_hbm (%p1467_p5), %s1528_s30, 16, %s1823_s6, [#allocation4]  }
 0x318   : > { %1510 = dma.done.wait (%p1467_p5), [#allocation4], 16  }
 0x319   : > { %1512 = vsyncadd (%p1467_p5), [#allocation4], 4294967280 }
 0x31a   : > { %1326 = sfence }
 0x31b PF: > { %s17_s21 = sadd.s32 1, %s1515_s21  }
 0x31c   : > { %p14_p11 = scmp.ge.s32.totalorder %s17_s21, 4  }
 0x31e   :  { %16 = sbr.rel (!%p14_p11) target bundleno = 1 (0x1), region = 90 }
 0x325   :  { %1332 = vsyncpa [#allocation4], 1 }
 0x326   :  { %1334 = vsyncpa [#allocation4 + $0x1], 1 }

</bundles_post_ra>
